<compile_context>
chip_gen: v7x
topology: tpu7x:2x2x1
jax: 0.10.0
libtpu: 0.0.40
codegen_flags: <defaults>
</compile_context>

<pallas_src>
import functools

import jax
import jax.numpy as jnp
from jax.experimental import pallas as pl
from jax.experimental.pallas import tpu as pltpu


def _layernorm_kernel(x_ref, w_ref, b_ref, o_ref, *, eps, inv_c):
    # x_ref: (tB, C, tT) block; normalize over axis=1 (channels).
    x = x_ref[...].astype(jnp.float32)

    # Two-pass statistics (matches the torch forward; no cancellation issues).
    mu = jnp.sum(x, axis=1, keepdims=True) * inv_c            # (tB, 1, tT)
    xc = x - mu
    var = jnp.sum(xc * xc, axis=1, keepdims=True) * inv_c     # (tB, 1, tT)
    rstd = jax.lax.rsqrt(var + eps)                           # EUP slot (cheap)

    # Plain epilogue: no full-rank scale/shift temporaries.
    o_ref[...] = ((xc * rstd) * w_ref[...] + b_ref[...]).astype(o_ref.dtype)


def _ceil_to(x, m):
    return -(-x // m) * m


def _vmem_params():
    """(vmem_limit_bytes, min_grid_steps), generation-aware with a safe fallback."""
    vmem_cap = None
    try:
        info = pltpu.get_tpu_info()
        vmem_cap = getattr(info, "vmem_capacity_bytes", None)
    except Exception:
        vmem_cap = None
    if vmem_cap is not None and vmem_cap >= 100 * 1024 * 1024:
        # v5e / v6e: 128 MiB physical VMEM, one TensorCore -> bigger blocks are fine.
        return 64 * 1024 * 1024, 2
    # v7x (64 MiB physical, 2 TCs) or unknown: stay conservative, keep both cores fed.
    return 32 * 1024 * 1024, 8


def _choose_tiles(B, C, T, itemsize, vmem_limit_bytes, min_grid_steps):
    """Pick (tB, tT) from the PADDED VMEM footprint of one block.

    Per lane column of the block we count: double-buffered input + output tiles in the
    native dtype (C padded to the sublane pack: 8/f32, 16/bf16, 32/int8; lanes padded
    to 128) plus ~3 f32 full-block temporaries used by the kernel body.
    """
    pack = max(8, 32 // max(itemsize, 1))
    cpad = _ceil_to(C, pack)
    cpad32 = _ceil_to(C, 8)
    col_bytes = 4 * cpad * itemsize + 3 * cpad32 * 4
    budget = vmem_limit_bytes // 2          # headroom for compiler internal scratch

    if T >= 128:
        # Lane-dense tiling: tT a multiple of 128; ragged edge handled by cdiv grid.
        budget_cols = max(128, budget // max(col_bytes, 1))
        tT = min((budget_cols // 128) * 128, _ceil_to(T, 128))
        tT = max(tT, 128)
    else:
        # Small T: block dim must equal the full array dim (stores are lane-masked).
        # TODO(synk): for T << 128 the real fix is a channel-last (B*T, C) layout
        # upstream; an in-kernel transpose would double HBM traffic for this mem-bound op.
        tT = T
    n_t = _ceil_to(T, tT) // tT

    # Fold batches per step to amortize per-step overhead, but keep >= min_grid_steps
    # total steps so v7x's second TensorCore isn't starved.
    slab_bytes = col_bytes * _ceil_to(tT, 128)
    tB = max(1, min(B, budget // max(slab_bytes, 1)))
    wanted_b_blocks = min(B, _ceil_to(min_grid_steps, n_t) // n_t)
    tB = min(tB, max(1, B // max(wanted_b_blocks, 1)))
    return tB, tT


def layernorm_bct(x, weight, bias, eps=1e-5):
    """x: (B, C, T); weight, bias: (C, 1). Normalizes over C (dim=1), like the torch module."""
    B, C, T = x.shape
    # Resident affine params: reshaped once wrapper-side to (1, C, 1) and pre-cast to
    # f32 so the kernel body has no per-step broadcast_in_dim / cast on them.
    w = weight.reshape(1, C, 1).astype(jnp.float32)
    b = bias.reshape(1, C, 1).astype(jnp.float32)

    vmem_limit, min_steps = _vmem_params()
    tB, tT = _choose_tiles(B, C, T, x.dtype.itemsize, vmem_limit, min_steps)
    kernel = functools.partial(_layernorm_kernel, eps=float(eps), inv_c=1.0 / C)

    return pl.pallas_call(
        kernel,
        out_shape=jax.ShapeDtypeStruct((B, C, T), x.dtype),
        grid_spec=pltpu.PrefetchScalarGridSpec(
            num_scalar_prefetch=0,
            grid=(pl.cdiv(B, tB), pl.cdiv(T, tT)),
            in_specs=[
                pl.BlockSpec((tB, C, tT), lambda i, j: (i, 0, j)),
                pl.BlockSpec((1, C, 1), lambda i, j: (0, 0, 0)),
                pl.BlockSpec((1, C, 1), lambda i, j: (0, 0, 0)),
            ],
            out_specs=pl.BlockSpec((tB, C, tT), lambda i, j: (i, 0, j)),
        ),
        compiler_params=pltpu.CompilerParams(
            dimension_semantics=("parallel", "parallel"),
            vmem_limit_bytes=vmem_limit,
        ),
    )(x, w, b)


def layernorm_ref(x, weight, bias, eps=1e-5):
    """Pure-JAX reference matching the PyTorch forward exactly."""
    x = x - jnp.mean(x, axis=1, keepdims=True)
    sigma = jnp.mean(x ** 2, axis=1, keepdims=True)
    x = x / jnp.sqrt(sigma + eps)
    return x * weight[None, :, :] + bias[None, :, :]


if __name__ == "__main__":
    B, C, T = 2, 4, 16
    key = jax.random.PRNGKey(0)
    kx, kw, kb = jax.random.split(key, 3)
    x = jax.random.normal(kx, (B, C, T), dtype=jnp.float32)

    # Parameters shaped as in the module's __init__ (affine=True): (C, 1).
    weight = 1.0 + 0.1 * jax.random.normal(kw, (C, 1), dtype=jnp.float32)
    bias = 0.1 * jax.random.normal(kb, (C, 1), dtype=jnp.float32)

    out = layernorm_bct(x, weight, bias, eps=1e-5)
    jax.block_until_ready(out)

    ref = layernorm_ref(x, weight, bias, eps=1e-5)
    assert out.shape == (B, C, T)
    assert jnp.allclose(out, ref, atol=1e-5, rtol=1e-5)

    print("KERNEL_OK")
</pallas_src>

<mosaic_0001>
module attributes {stable_mosaic.version = 11 : i64} {
  func.func @_layernorm_kernel(%arg0: i32, %arg1: i32, %arg2: memref<1x4x16xf32, #tpu.memory_space<vmem>>, %arg3: memref<1x4x1xf32, #tpu.memory_space<vmem>>, %arg4: memref<1x4x1xf32, #tpu.memory_space<vmem>>, %arg5: memref<1x4x16xf32, #tpu.memory_space<vmem>>) attributes {dimension_semantics = [#tpu.dimension_semantics<parallel>, #tpu.dimension_semantics<parallel>], iteration_bounds = array<i64: 2, 1>, scalar_prefetch = 0 : i64, scratch_operands = 0 : i64, tpu.core_type = #tpu.core_type<tc>, window_params = [{transform_indices = @transform_0, window_bounds = array<i64: 1, 4, 16>}, {pipeline_mode = #tpu.pipeline_mode<synchronous>, transform_indices = @transform_1, window_bounds = array<i64: 1, 4, 1>}, {pipeline_mode = #tpu.pipeline_mode<synchronous>, transform_indices = @transform_2, window_bounds = array<i64: 1, 4, 1>}, {transform_indices = @transform_3, window_bounds = array<i64: 1, 4, 16>}]} {
    %c0 = arith.constant 0 : index
    %c0_0 = arith.constant 0 : index
    %c0_1 = arith.constant 0 : index
    %0 = vector.load %arg2[%c0, %c0_0, %c0_1] : memref<1x4x16xf32, #tpu.memory_space<vmem>>, vector<1x4x16xf32>
    %cst = arith.constant dense<0.000000e+00> : vector<1x16xf32>
    %1 = vector.multi_reduction <add>, %0, %cst [1] : vector<1x4x16xf32> to vector<1x16xf32>
    %2 = vector.shape_cast %1 : vector<1x16xf32> to vector<1x1x16xf32>
    %cst_2 = arith.constant 2.500000e-01 : f32
    %3 = vector.broadcast %cst_2 : f32 to vector<1x1x16xf32>
    %4 = arith.mulf %2, %3 : vector<1x1x16xf32>
    %5 = vector.broadcast %4 : vector<1x1x16xf32> to vector<1x4x16xf32>
    %6 = arith.subf %0, %5 : vector<1x4x16xf32>
    %7 = arith.mulf %6, %6 : vector<1x4x16xf32>
    %cst_3 = arith.constant dense<0.000000e+00> : vector<1x16xf32>
    %8 = vector.multi_reduction <add>, %7, %cst_3 [1] : vector<1x4x16xf32> to vector<1x16xf32>
    %9 = vector.shape_cast %8 : vector<1x16xf32> to vector<1x1x16xf32>
    %cst_4 = arith.constant 2.500000e-01 : f32
    %10 = vector.broadcast %cst_4 : f32 to vector<1x1x16xf32>
    %11 = arith.mulf %9, %10 : vector<1x1x16xf32>
    %cst_5 = arith.constant 9.99999974E-6 : f32
    %12 = vector.broadcast %cst_5 : f32 to vector<1x1x16xf32>
    %13 = arith.addf %11, %12 : vector<1x1x16xf32>
    %14 = math.rsqrt %13 : vector<1x1x16xf32>
    %15 = vector.broadcast %14 : vector<1x1x16xf32> to vector<1x4x16xf32>
    %16 = arith.mulf %6, %15 : vector<1x4x16xf32>
    %c0_6 = arith.constant 0 : index
    %c0_7 = arith.constant 0 : index
    %c0_8 = arith.constant 0 : index
    %17 = vector.load %arg3[%c0_6, %c0_7, %c0_8] : memref<1x4x1xf32, #tpu.memory_space<vmem>>, vector<1x4x1xf32>
    %18 = vector.broadcast %17 : vector<1x4x1xf32> to vector<1x4x16xf32>
    %19 = arith.mulf %16, %18 : vector<1x4x16xf32>
    %c0_9 = arith.constant 0 : index
    %c0_10 = arith.constant 0 : index
    %c0_11 = arith.constant 0 : index
    %20 = vector.load %arg4[%c0_9, %c0_10, %c0_11] : memref<1x4x1xf32, #tpu.memory_space<vmem>>, vector<1x4x1xf32>
    %21 = vector.broadcast %20 : vector<1x4x1xf32> to vector<1x4x16xf32>
    %22 = arith.addf %19, %21 : vector<1x4x16xf32>
    %c0_12 = arith.constant 0 : index
    %c0_13 = arith.constant 0 : index
    %c0_14 = arith.constant 0 : index
    %23 = vector.load %arg5[%c0_12, %c0_13, %c0_14] : memref<1x4x16xf32, #tpu.memory_space<vmem>>, vector<1x4x16xf32>
    tpu.vector_store %arg5[%c0_12, %c0_13, %c0_14], %22 {strides = array<i32>} : memref<1x4x16xf32, #tpu.memory_space<vmem>>, vector<1x4x16xf32>,
    return
  }
  func.func @transform_0(%arg0: i32, %arg1: i32) -> (i32, i32, i32) {
    %c0_i32 = arith.constant 0 : i32
    %c0_i32_0 = arith.constant 0 : i32
    return %arg0, %c0_i32, %arg1 : i32, i32, i32
  }
  func.func @transform_1(%arg0: i32, %arg1: i32) -> (i32, i32, i32) {
    %c0_i32 = arith.constant 0 : i32
    %c0_i32_0 = arith.constant 0 : i32
    %c0_i32_1 = arith.constant 0 : i32
    %c0_i32_2 = arith.constant 0 : i32
    return %c0_i32, %c0_i32_0, %c0_i32_1 : i32, i32, i32
  }
  func.func @transform_2(%arg0: i32, %arg1: i32) -> (i32, i32, i32) {
    %c0_i32 = arith.constant 0 : i32
    %c0_i32_0 = arith.constant 0 : i32
    %c0_i32_1 = arith.constant 0 : i32
    %c0_i32_2 = arith.constant 0 : i32
    return %c0_i32, %c0_i32_0, %c0_i32_1 : i32, i32, i32
  }
  func.func @transform_3(%arg0: i32, %arg1: i32) -> (i32, i32, i32) {
    %c0_i32 = arith.constant 0 : i32
    %c0_i32_0 = arith.constant 0 : i32
    return %arg0, %c0_i32, %arg1 : i32, i32, i32
  }
}

</mosaic_0001>

<bundles_post_ra>
// kernel: tpu_custom_call.1
= control target key start
LH: loop header
LB: loop body
LE: loop exit
PB: predicated region body
PF: predicated region fallthrough
CT: control target
= control target key end

     0   :  { %8 = vsyncpa [#allocation3], 0  ;;  %s608_s0 = inlined_call_operand.vmem [shape: f32[2,4,16], index: 0, kind: input, shape index: {}]   ;;  %s609_s1 = inlined_call_operand.vmem [shape: f32[1,4,1], index: 1, kind: input, shape index: {}]   ;;  %s610_s2 = inlined_call_operand.vmem [shape: f32[1,4,1], index: 2, kind: input, shape index: {}]   ;;  %s611_s3 = inlined_call_operand.hbm [shape: f32[2,4,16], index: 3, kind: output, shape index: {}]  }
   0x1   :  { %10 = vsyncpa [#allocation3 + $0x1], 0  ;;  %s487_s12 = smov 0   ;;  %s489_s13 = smov 0  }
   0x2   :  { %s491_s14 = smov 0   ;;  %s493_s15 = smov 0  }
   0x3   :  { %s495_s16 = smov 0   ;;  %s497_s17 = smov 0  }
   0x4 LB: > { %s315_s18 = sadd.s32 4294967295, %s463_s17   ;;  %s316_s19 = sadd.s32 4294967294, %s463_s17   ;;  %s463_s17 = sphi %s497_s17, %s16_s17   ;;  %s459_s16 = sphi %s495_s16, %s618_s16   ;;  %s455_s15 = sphi %s493_s15, %s617_s15   ;;  %s451_s14 = sphi %s491_s14, %s616_s14   ;;  %s447_s13 = sphi %s489_s13, %s615_s13   ;;  %s443_s12 = sphi %s487_s12, %s614_s12  }
   0x5   : > { %s28_s20 = sadd.s32 1, %s459_s16  ;;  %s107_s21 = sadd.s32 1, %s451_s14 }
   0x6   : > { %p30_p0 = scmp.ge.s32.totalorder %s28_s20, 2  ;;  %p117_p1 = scmp.ne.s32.totalorder %s451_s14, %s447_s13 }
   0x7   : > { %p118_p2 = scmp.eq.s32.totalorder %s315_s18, 1  ;;  %p123_p3 = scmp.ne.s32.totalorder %s447_s13, %s443_s12 }
   0x8   : > { %s620_s20 = smov (%p30_p0, %s28_s20), 0  ;;  %p124_p5 = scmp.eq.s32.totalorder %s316_s19, 1 }
   0x9   : > { %p527_p4 = por %p118_p2, %p117_p1  ;;  %s102_s23 = ssub.s32 %s459_s16, %s620_s20 }
   0xa   : > { %p319_p6 = scmp.ge.s32.totalorder %s463_s17, 1  ;;  %p105_p7 = scmp.eq.s32.totalorder %s102_s23, 0 }
   0xb   : > { %p534_p8 = por %p124_p5, %p123_p3  ;;  %p158_p9 = scmp.lt.s32.totalorder %s463_s17, 3 }
   0xc   : > { %s540_s25 = scalar_select %p105_p7, %s451_s14, %s107_s21  }
   0xd   : > { %p159_p10 = pnand %p319_p6, %p158_p9 }
   0xe   : > { %v214_v0 = vld [vmem:[%s609_s1] sm:$0xf] (!%p159_p10)  ;;  %v465_v1 = vmov (!%p159_p10), 0   ;;  %p184_p11 = scmp.lt.s32.totalorder (!%p159_p10), %s455_s15, 1  ;;  %vm192_vm0 = vcmask (!%p159_p10), 125952   ;;  %s181_s8 = sand.u32 (!%p159_p10), 1, %s447_s13  }
   0xf   : > { %162 = sbr.rel (%p159_p10) target bundleno = 164 (0xa4), region = 32  ;;  %382 = vset.pattern.permute.xlu0 (!%p159_p10), %v465_v1  ;;  %v221_v2 = vld [vmem:[%s610_s2] sm:$0xf] (!%p159_p10)  ;;  %s320_s9 = sshll.u32 (!%p159_p10), %s181_s8, 2 }
  0x10   : > { %217 = vperm.xlu0 (!%p159_p10), %382, %v214_v0   ;;  %s323_s10 = sshll.u32 (!%p159_p10), %s455_s15, 6  ;;  %s183_s11 = scalar_lea.vmem (!%p159_p10), [#allocation2], %s320_s9 }
  0x11   : > { %s244_s18 = sshll.u32 (!%p159_p10), %s183_s11, 4  ;;  %s560_s23 = scalar_lea.hbm (!%p159_p10), %s611_s3, %s323_s10  ;;  %s562_s18 = int_to_ptr.vmem [resolvable:$true] %s244_s18 }
  0x12   : > { %s230_s26 = scalar_lea.sflag (!%p159_p10), [#allocation3], %s181_s8  ;;  %s385_s27 = scalar_lea.vmem (!%p159_p10), %s562_s18, 64 }
  0x13   : > { %p386_p12 = scmp.ne.s32.totalorder (!%p159_p10), %s562_s18, %s385_s27 }
  0x14   : > { %224 = vperm.xlu0 (!%p159_p10), %382, %v221_v2  }
  0x15   : > { %p387_p13 = pnand (!%p159_p10), %p386_p12, %p527_p4 }
  0x16   : > { %s185_s30 = scalar_select %p184_p11, %s455_s15, 1 }
  0x17   : > { %p388_p0 = pneg %p387_p13  ;;  %s466_s15 = smov [#allocation2]  }
  0x18   : > { %s321_s4 = sshll.u32 %s185_s30, 2  ;;  %s389_s28 = sshll.u32 %s466_s15, 4  ;;  %s390_s28 = int_to_ptr.vmem [resolvable:$false] %s389_s28 }
  0x19   : > { %s190_s7 = scalar_lea.vmem %s608_s0, %s321_s4  ;;  %s391_s29 = scalar_lea.vmem %s390_s28, 128 }
  0x1a   : > { %v191_v3 = vld [vmem:[%s190_s7] sm:$0xf]  ;;  %p392_p1 = scmp.lt.s32.totalorder %s562_s18, %s390_s28  ;;  %p393_p2 = scmp.lt.s32.totalorder %s391_s29, %s385_s27 }
  0x1b   : > { %v193_v4 = vsel %vm192_vm0, %v191_v3, 0.0 }
  0x1c   : > { %v194_v5 = vrot.slane %v193_v4, 4  ;;  %p394_p3 = por %p393_p2, %p392_p1 }
  0x1e   : > { %v195_v6 = vadd.f32 %v194_v5, %v193_v4  ;;  %p395_p5 = pnand %p394_p3, %p388_p0 }
  0x20   : > { %v196_v7 = vrot.slane %v195_v6, 2 }
  0x22   : > { %v197_v8 = vadd.f32 %v196_v7, %v195_v6 }
  0x24   : > { %v198_v9 = vrot.slane %v197_v8, 1 }
  0x26   : > { %v199_v10 = vadd.f32 %v198_v9, %v197_v8 }
  0x28   : > { %v200_v11 = vmul.f32 0.25, %v199_v10 }
  0x2a   : > { %v201_v12 = vsub.f32 %v191_v3, %v200_v11 }
  0x2c   : > { %v202_v13 = vmul.f32 %v201_v12, %v201_v12 }
  0x2e   : > { %v203_v14 = vsel %vm192_vm0, %v202_v13, 0.0 }
  0x2f   : > { %v204_v15 = vrot.slane %v203_v14, 4 }
  0x31   : > { %v205_v16 = vadd.f32 %v204_v15, %v203_v14 }
  0x33   : > { %v206_v17 = vrot.slane %v205_v16, 2 }
  0x35   : > { %v207_v18 = vadd.f32 %v206_v17, %v205_v16 }
  0x37   : > { %v208_v19 = vrot.slane %v207_v18, 1 }
  0x39   : > { %v209_v20 = vadd.f32 %v208_v19, %v207_v18 }
  0x3b   : > { %v210_v21 = vmul.f32 0.25, %v209_v20 }
  0x3d   : > { %v211_v22 = vadd.f32 1e-05, %v210_v21 }
  0x3f   : > { %383 = vrsqrt.f32 %v211_v22 }
  0x49   : > { %v384_v23 = vpop.eup %383 }
  0x4a   : > { %v213_v24 = vmul.f32 %v384_v23, %v201_v12 }
  0x8f   : > { %v218_v25 = vpop.permute.xlu0 %217 }
  0x90   : > { %v220_v26 = vmul.f32 %v218_v25, %v213_v24 }
  0x93   : > { %v225_v27 = vpop.permute.xlu0 %224 }
  0x94   : > { %v227_v28 = vadd.f32 %v225_v27, %v220_v26 }
  0x96   : > { %228 = vst.msk [vmem:[%s183_s11] sm:$0xf] %vm192_vm0, %v227_v28 }
  0x97   : > { %398 = shalt.err (!%p395_p5)
}
  0x98   : > { %s399_s30 = scalar_lea.hbm %s560_s23, 64  ;;  %s403_s6 = scalar_lea.hbm %s611_s3, 128 }
  0x99   : > { %p400_p6 = scmp.ne.s32.totalorder %s560_s23, %s399_s30  ;;  %p404_p10 = scmp.lt.u32.totalorder %s560_s23, %s611_s3 }
  0x9a   : > { %p405_p11 = scmp.lt.u32.totalorder %s403_s6, %s399_s30  ;;  %p407_p13 = scmp.lt.u32.totalorder %s399_s30, %s560_s23 }
  0x9b   : > { %p401_p7 = pnand %p400_p6, %p527_p4 }
  0x9c   : > { %p406_p12 = por %p405_p11, %p404_p10 }
  0x9d   : > { %p402_p9 = pneg %p401_p7 }
  0x9e   : > { %p408_p0 = por %p407_p13, %p406_p12 }
  0xa0   : > { %p409_p1 = pnand %p408_p0, %p402_p9 }
  0xa2   : > { %412 = shalt.err (!%p409_p1)
}
  0xa3   : > { %326 = dma.vmem_to_hbm [thread:$0]  (%p527_p4), %s562_s18, 64, %s560_s23, %s230_s26  }
  0xa4 PF: > { %p332_p2 = scmp.ge.s32.totalorder %s463_s17, 2  ;;  %s256_s9 = sand.u32 1, %s443_s12  }
  0xa5   : > { %s257_s10 = scalar_lea.sflag [#allocation3], %s256_s9 }
  0xa6   : > { %p329_p3 = pnand %p332_p2, %p534_p8 }
  0xa8   : > { %438 = dma.done.wait (!%p329_p3), %s257_s10, 64  }
  0xa9   : > { %440 = vsyncadd (!%p329_p3), %s257_s10, 4294967232  ;;  %s16_s17 = sadd.s32 1, %s463_s17   ;;  %s614_s12 = smov %s447_s13 }
  0xaa   : > { %p13_p5 = scmp.ge.s32.totalorder %s16_s17, 4   ;;  %s615_s13 = smov %s451_s14 }
  0xab   : > { %s616_s14 = smov %s540_s25  ;;  %s617_s15 = smov %s459_s16 }
  0xac   : > { %s618_s16 = smov %s620_s20  ;;  %15 = sbr.rel (!%p13_p5) target bundleno = 4 (0x4), region = 67 }
  0xb3   :  { %262 = vsyncpa [#allocation3], 1 }
  0xb4   :  { %264 = vsyncpa [#allocation3 + $0x1], 1 }

</bundles_post_ra>
